<compile_context>
chip_gen: v6e
topology: v6e:2x2x1
jax: 0.10.0
libtpu: 0.0.40
codegen_flags: <defaults>
</compile_context>

<pallas_src>
import math

import jax
import jax.numpy as jnp
from jax.experimental import pallas as pl
from jax.experimental.pallas import tpu as pltpu


def _eca_k_size(channels, gamma=2, b=1):
    t = int(abs((math.log(channels, 2) + b) / gamma))
    return t if t % 2 else t + 1


def _vmem_budget_bytes():
    """~80% of the chip's VMEM: leaves headroom for compiler scratch / semaphores.
    Falls back to the smallest per-core VMEM (v7x, 64 MiB) if the query is unavailable."""
    try:
        cap = int(pltpu.get_tpu_info().vmem_capacity_bytes)
    except Exception:
        cap = 64 << 20
    return (cap * 4) // 5


def _pick_batch_block(n, per_batch_bytes, target_bytes):
    """Batch rows per grid step: near the byte target, >= 2 steps whenever N >= 2 (so
    both v7x TensorCores get work) and preferring an even step count for 2-TC balance.
    The grid uses pl.cdiv, so nb does NOT need to divide N (ragged final block)."""
    nb = max(1, min(n, target_bytes // max(per_batch_bytes, 1)))
    if n >= 2:
        nb = min(nb, pl.cdiv(n, 2))
        steps = pl.cdiv(n, nb)
        if steps % 2:
            nb = max(1, pl.cdiv(n, steps + 1))
    return nb


def eca_kernel(x_ref, w_ref, o_ref):
    # x_ref: (nb, C, L) input tile;  w_ref: (C, C) center conv tap, pre-transposed and
    # pre-scaled by 1/L.  All per-step compute is tiny vs. the HBM-bound tile DMA.
    x = x_ref[...]
    w = w_ref[...]
    # Global-average-pool: f32-accumulated sum over L (1/L already folded into w).
    # dtype=f32 keeps accumulation exact without materializing an f32 copy of the tile.
    pooled = jnp.sum(x, axis=-1, dtype=jnp.float32)                  # (nb, C)
    # Conv1d on the length-1 zero-padded sequence == one (nb,C)@(C,C) MXU matmul.
    y = jnp.dot(pooled, w, preferred_element_type=jnp.float32)       # (nb, C)
    s = jax.nn.sigmoid(y)                                            # (nb, C)
    o_ref[...] = (x * s[:, :, None].astype(x.dtype)).astype(o_ref.dtype)


def eca_layer(x, conv_weight, *, target_tile_bytes=8 << 20):
    """x: (N, C, L); conv_weight: (C, C, k) PyTorch Conv1d weight (out, in, k)."""
    N, C, L = x.shape
    k = conv_weight.shape[-1]

    # Only the center tap of the zero-padded length-1 conv contributes; fold the
    # AdaptiveAvgPool1d 1/L into it and pre-transpose so the kernel computes
    # pooled_sum @ w directly (no in-kernel transpose, no per-element mean scale).
    w = (conv_weight[:, :, (k - 1) // 2].T / float(L)).astype(jnp.float32)  # (C_in, C_out)

    itemsize = x.dtype.itemsize
    per_batch = C * L * itemsize
    nb = _pick_batch_block(N, per_batch, target_tile_bytes)
    grid = (pl.cdiv(N, nb),)

    # Double-buffered input + output tiles, double-buffered (tiny) weight, margin;
    # capped at ~80% of physical VMEM (critical on v7x where VMEM is 64 MiB/TC).
    tile_bytes = nb * per_batch
    want = 4 * tile_bytes + 2 * (C * C * 4) + (4 << 20)
    vmem_limit = int(min(max(want, 32 << 20), _vmem_budget_bytes()))
    # NOTE: if a single (C, L) batch row ever exceeds the VMEM budget (huge C*L),
    # restructure to a two-pass scheme (L grid axis with pl.when-accumulated sums,
    # then a tiled scale pass).

    cost = pl.CostEstimate(
        flops=2 * N * C * L + 2 * N * C * C,       # L-reduce + broadcast scale + channel matmul
        transcendentals=N * C,                      # sigmoid
        bytes_accessed=2 * N * C * L * itemsize + C * C * 4,
    )

    return pl.pallas_call(
        eca_kernel,
        out_shape=jax.ShapeDtypeStruct((N, C, L), x.dtype),
        grid_spec=pltpu.PrefetchScalarGridSpec(
            num_scalar_prefetch=0,
            grid=grid,
            in_specs=[
                # Trailing dims are the full (C, L): exempt from the (8,128) rule, so
                # no HBM-level pad/slice is needed for unaligned L.
                pl.BlockSpec((nb, C, L), lambda i: (i, 0, 0)),
                pl.BlockSpec((C, C), lambda i: (0, 0)),   # shared weight (constant block)
            ],
            out_specs=pl.BlockSpec((nb, C, L), lambda i: (i, 0, 0)),
        ),
        compiler_params=pltpu.CompilerParams(
            dimension_semantics=("parallel",),
            vmem_limit_bytes=vmem_limit,
        ),
        cost_estimate=cost,
    )(x, w)


if __name__ == "__main__":
    def reference(x, conv_w):
        """Pure-JAX reference of the exact PyTorch forward."""
        kk = conv_w.shape[-1]
        pooled = x.mean(axis=-1, keepdims=True)                                  # (N, C, 1)
        y = jnp.einsum("oc,ncl->nol", conv_w[:, :, (kk - 1) // 2], pooled)       # (N, C, 1)
        return x * jax.nn.sigmoid(y)

    key = jax.random.PRNGKey(0)
    # Second case (N=3) exercises the ragged (cdiv) final batch block: nb=2, 2 steps.
    for (N, C, L) in [(2, 8, 16), (3, 8, 20)]:
        key, kx, kw = jax.random.split(key, 3)
        x = jax.random.normal(kx, (N, C, L), dtype=jnp.float32)

        # Deterministic Conv1d weight (PyTorch-like kaiming-uniform bound, fixed seed).
        k_size = _eca_k_size(C)                     # C=8 -> k=3, padding=1
        bound = 1.0 / math.sqrt(C * k_size)
        conv_w = jax.random.uniform(kw, (C, C, k_size), jnp.float32, -bound, bound)

        out = jax.block_until_ready(eca_layer(x, conv_w))
        ref = reference(x, conv_w)

        assert out.shape == x.shape
        assert jnp.allclose(out, ref, atol=1e-5, rtol=1e-5), f"mismatch vs reference at {(N, C, L)}"

    print("KERNEL_OK")
</pallas_src>

<mosaic_0001>
module attributes {stable_mosaic.version = 11 : i64} {
  func.func @eca_kernel(%arg0: i32, %arg1: memref<1x8x16xf32, #tpu.memory_space<vmem>>, %arg2: memref<8x8xf32, #tpu.memory_space<vmem>>, %arg3: memref<1x8x16xf32, #tpu.memory_space<vmem>>) attributes {dimension_semantics = [#tpu.dimension_semantics<parallel>], iteration_bounds = array<i64: 2>, scalar_prefetch = 0 : i64, scratch_operands = 0 : i64, tpu.core_type = #tpu.core_type<tc>, window_params = [{transform_indices = @transform_0, window_bounds = array<i64: 1, 8, 16>}, {pipeline_mode = #tpu.pipeline_mode<synchronous>, transform_indices = @transform_1, window_bounds = array<i64: 8, 8>}, {transform_indices = @transform_2, window_bounds = array<i64: 1, 8, 16>}]} {
    %c0 = arith.constant 0 : index
    %c0_0 = arith.constant 0 : index
    %c0_1 = arith.constant 0 : index
    %0 = vector.load %arg1[%c0, %c0_0, %c0_1] : memref<1x8x16xf32, #tpu.memory_space<vmem>>, vector<1x8x16xf32>
    %c0_2 = arith.constant 0 : index
    %c0_3 = arith.constant 0 : index
    %1 = vector.load %arg2[%c0_2, %c0_3] : memref<8x8xf32, #tpu.memory_space<vmem>>, vector<8x8xf32>
    %cst = arith.constant dense<0.000000e+00> : vector<1x8xf32>
    %2 = vector.multi_reduction <add>, %0, %cst [2] : vector<1x8x16xf32> to vector<1x8xf32>
    %cst_4 = arith.constant dense<0.000000e+00> : vector<1x8xf32>
    %3 = tpu.matmul %2, %1, %cst_4 {dimension_numbers = #tpu.dot_dimension_numbers<[1], [0], [0], [1], [0, 0, 1, 1], [], []>} : vector<1x8xf32>, vector<8x8xf32>, vector<1x8xf32> -> vector<1x8xf32>
    %4 = arith.negf %3 : vector<1x8xf32>
    %5 = math.exp %4 : vector<1x8xf32>
    %cst_5 = arith.constant 1.000000e+00 : f32
    %6 = vector.broadcast %cst_5 : f32 to vector<1x8xf32>
    %7 = arith.addf %6, %5 : vector<1x8xf32>
    %8 = arith.divf %6, %7 : vector<1x8xf32>
    %9 = vector.shape_cast %8 : vector<1x8xf32> to vector<1x8x1xf32>
    %10 = vector.broadcast %9 : vector<1x8x1xf32> to vector<1x8x16xf32>
    %11 = arith.mulf %0, %10 : vector<1x8x16xf32>
    %c0_6 = arith.constant 0 : index
    %c0_7 = arith.constant 0 : index
    %c0_8 = arith.constant 0 : index
    %12 = vector.load %arg3[%c0_6, %c0_7, %c0_8] : memref<1x8x16xf32, #tpu.memory_space<vmem>>, vector<1x8x16xf32>
    tpu.vector_store %arg3[%c0_6, %c0_7, %c0_8], %11 {strides = array<i32>} : memref<1x8x16xf32, #tpu.memory_space<vmem>>, vector<1x8x16xf32>,
    return
  }
  func.func @transform_0(%arg0: i32) -> (i32, i32, i32) {
    %c0_i32 = arith.constant 0 : i32
    %c0_i32_0 = arith.constant 0 : i32
    %c0_i32_1 = arith.constant 0 : i32
    return %arg0, %c0_i32, %c0_i32_0 : i32, i32, i32
  }
  func.func @transform_1(%arg0: i32) -> (i32, i32) {
    %c0_i32 = arith.constant 0 : i32
    %c0_i32_0 = arith.constant 0 : i32
    %c0_i32_1 = arith.constant 0 : i32
    return %c0_i32, %c0_i32_0 : i32, i32
  }
  func.func @transform_2(%arg0: i32) -> (i32, i32, i32) {
    %c0_i32 = arith.constant 0 : i32
    %c0_i32_0 = arith.constant 0 : i32
    %c0_i32_1 = arith.constant 0 : i32
    return %arg0, %c0_i32, %c0_i32_0 : i32, i32, i32
  }
}

</mosaic_0001>

<bundles_post_ra>
// kernel: tpu_custom_call.1
= control target key start
LH: loop header
LB: loop body
LE: loop exit
PB: predicated region body
PF: predicated region fallthrough
CT: control target
= control target key end

     0   :  { %7 = vsyncpa [#allocation3], 0  ;;  %s769_s0 = inlined_call_operand.hbm [shape: f32[2,8,16], index: 0, kind: input, shape index: {}]   ;;  %s770_s1 = inlined_call_operand.hbm [shape: f32[8,8], index: 1, kind: input, shape index: {}]   ;;  %s771_s2 = inlined_call_operand.hbm [shape: f32[2,8,16], index: 2, kind: output, shape index: {}]  }
   0x1   :  { %9 = vsyncpa [#allocation3 + $0x1], 0 }
   0x2   :  { %10 = vsyncpa [#allocation6], 0 }
   0x3   :  { %11 = vsyncpa [#allocation4], 0 }
   0x4   :  { %13 = vsyncpa [#allocation4 + $0x1], 0  ;;  %s597_s9 = smov 0   ;;  %s599_s10 = smov 0  }
   0x5   :  { %s601_s11 = smov 0   ;;  %s603_s12 = smov 0  }
   0x6 LB: > { %s618_s13 = sadd.s32 4294967295, %s575_s12   ;;  %s367_s14 = sadd.s32 4294967294, %s575_s12   ;;  %s575_s12 = sphi %s603_s12, %s794_s12   ;;  %s571_s11 = sphi %s601_s11, %s793_s11   ;;  %s567_s10 = sphi %s599_s10, %s792_s10   ;;  %s563_s9 = sphi %s597_s9, %s791_s9  }
   0x7   : > { %p39_p0 = scmp.ne.s32.totalorder %s567_s10, %s563_s9  ;;  %p772_p1 = scmp.eq.s32.totalorder %s618_s13, 0 }
   0x8   : > { %p90_p3 = scmp.eq.s32.totalorder %s367_s14, 1  ;;  %p368_p5 = scmp.ge.s32.totalorder %s575_s12, 1 }
   0x9   : > { %p627_p4 = por %p772_p1, %p39_p0  ;;  %p97_p7 = scmp.lt.s32.totalorder %s575_s12, 3 }
   0xa   : > { %p632_p6 = por %p90_p3, %p39_p0  ;;  %s577_s18 = smov [#allocation5]  }
   0xb   : > { %s776_s15 = scalar_select %p627_p4, 1, 0 }
   0xc   : > { %s777_s16 = scalar_select %p632_p6, 1, 0 }
   0xd   : > { %p637_p8 = pnand %p368_p5, %p97_p7  ;;  %s110_s19 = sshll.u32 %s577_s18, 4  ;;  %s111_s19 = int_to_ptr.vmem [resolvable:$true] %s110_s19 }
   0xe   : > { %s645_s20 = sadd.s32 1, %s575_s12   ;;  %s26_s24 = sadd.s32 1, %s571_s11 }
   0xf   : > { %s778_s17 = scalar_select %p637_p8, 1, 0 }
  0x10   : > { %p398_p10 = pneg %p637_p8  ;;  %s23_s22 = ssub.s32 %s575_s12, %s645_s20 }
  0x11   : > { %p655_p12 = scmp.eq.s32.totalorder %s23_s22, 0  ;;  %p33_p13 = scmp.ne.s32.totalorder %s571_s11, %s567_s10 }
  0x12   : > { %p649_p11 = pnand %p398_p10, %p772_p1  ;;  %s464_s25 = scalar_lea.vmem %s111_s19, 128 }
  0x13   : > { %p465_p3 = scmp.ne.s32.totalorder %s111_s19, %s464_s25  ;;  %p472_p9 = scmp.lt.s32.totalorder %s111_s19, %s111_s19 }
  0x14   : > { %p455_p0 = pneg %p649_p11  ;;  %p473_p2 = scmp.lt.s32.totalorder %s464_s25, %s464_s25 }
  0x16   : > { %p467_p5 = pnand %p465_p3, %p455_p0  ;;  %p474_p10 = por %p473_p2, %p472_p9 }
  0x18   : > { %p468_p7 = pneg %p467_p5 }
  0x1a   : > { %p475_p1 = pnand %p474_p10, %p468_p7 }
  0x1c   : > { %478 = shalt.err (!%p475_p1)
}
  0x1d   : > { %401 = dma.hbm_to_vmem [thread:$0]  (!%p649_p11), %s770_s1, 128, %s111_s19, [#allocation6]  }
  0x1e   : > { %s672_s28 = scalar_select %p655_p12, %s571_s11, %s26_s24  }
  0x1f   : > { %p34_p1 = scmp.eq.s32.totalorder %s575_s12, 0  ;;  %p781_p2 = scmp.eq.s32.totalorder %s618_s13, 1 }
  0x20   : > { %p411_p0 = scmp.lt.s32.totalorder %s575_s12, 2  ;;  %s121_s30 = sand.u32 1, %s571_s11  }
  0x21   : > { %p680_p9 = por %p781_p2, %p33_p13  ;;  %p35_p3 = por %p34_p1, %p33_p13 }
  0x22   : > { %s371_s3 = sshll.u32 %s121_s30, 3  ;;  %s372_s4 = sshll.u32 %s575_s12, 7 }
  0x23   : > { %s782_s29 = scalar_select %p680_p9, 1, 0 }
  0x24   : > { %s693_s7 = scalar_lea.hbm %s769_s0, %s372_s4  ;;  %s125_s8 = scalar_lea.vmem [#allocation2], %s371_s3 }
  0x25   : > { %s132_s14 = sshll.u32 %s125_s8, 4  ;;  %p695_p11 = pnand %p411_p0, %p35_p3  ;;  %s133_s14 = int_to_ptr.vmem [resolvable:$true] %s132_s14 }
  0x26   : > { %s122_s19 = scalar_lea.sflag [#allocation3], %s121_s30  ;;  %s479_s21 = scalar_lea.hbm %s693_s7, 128 }
  0x27   : > { %p480_p12 = scmp.ne.s32.totalorder %s693_s7, %s479_s21  ;;  %p481_p13 = pneg %p695_p11 }
  0x28   : > { %s484_s24 = scalar_lea.hbm %s769_s0, 256  ;;  %p485_p10 = scmp.lt.s32.totalorder %s693_s7, %s769_s0 }
  0x29   : > { %p482_p5 = pnand %p481_p13, %p480_p12  ;;  %p486_p1 = scmp.lt.s32.totalorder %s484_s24, %s479_s21 }
  0x2b   : > { %p483_p7 = pneg %p482_p5  ;;  %p487_p2 = por %p486_p1, %p485_p10 }
  0x2d   : > { %p488_p0 = pnand %p487_p2, %p483_p7 }
  0x2f   : > { %491 = shalt.err (!%p488_p0)
}
  0x30   : > { %s492_s27 = scalar_lea.vmem %s133_s14, 128  ;;  %s578_s30 = smov [#allocation2]  }
  0x31   : > { %p493_p3 = scmp.ne.s32.totalorder %s133_s14, %s492_s27  ;;  %s497_s3 = sshll.u32 %s578_s30, 4  ;;  %s498_s3 = int_to_ptr.vmem [resolvable:$false] %s497_s3 }
  0x32   : > { %s499_s4 = scalar_lea.vmem %s498_s3, 256  ;;  %p500_p12 = scmp.lt.s32.totalorder %s133_s14, %s498_s3 }
  0x33   : > { %p495_p6 = pnand %p493_p3, %p481_p13  ;;  %p501_p5 = scmp.lt.s32.totalorder %s499_s4, %s492_s27 }
  0x35   : > { %p496_p9 = pneg %p495_p6  ;;  %p502_p4 = por %p501_p5, %p500_p12 }
  0x37   : > { %p503_p8 = pnand %p502_p4, %p496_p9 }
  0x39   : > { %506 = shalt.err (!%p503_p8)
}
  0x3a   : > { %405 = dma.hbm_to_vmem [thread:$0]  (!%p695_p11), %s693_s7, 128, %s133_s14, %s122_s19  }
  0x3b   : > { %p784_p7 = scmp.ne.s32.totalorder %s778_s17, 0 }
  0x3c   : > { %s716_s5 = sand.u32 (!%p784_p7), 1, %s567_s10   ;;  %p785_p4 = scmp.ne.s32.totalorder (!%p784_p7), %s776_s15, 0 }
  0x3d   : > { %141 = sbr.rel (%p784_p7) target bundleno = 569 (0x239), region = 28  ;;  %s374_s6 = sshll.u32 (!%p784_p7), %s716_s5, 3 }
  0x3e   : > { %s144_s8 = scalar_lea.sflag (!%p784_p7), [#allocation3], %s716_s5  ;;  %s147_s21 = scalar_lea.vmem (!%p784_p7), [#allocation2], %s374_s6 }
  0x42   : > { %550 = dma.done.wait (%p785_p4), %s144_s8, 128  }
  0x43   : > { %552 = vsyncadd (%p785_p4), %s144_s8, 4294967168  ;;  %p786_p6 = scmp.eq.s32.totalorder %s618_s13, 0 }
  0x45   : > { %554 = dma.done.wait (%p786_p6), [#allocation6], 128   ;;  %p787_p8 = pmov %p786_p6 }
  0x46   : > { %vm174_vm0 = vcmask 130048   ;;  %v172_v0 = vld [vmem:[%s147_s21] sm:$0xff]  ;;  %v579_v2 = vmov 0.0   ;;  %v173_v3 = vld [vmem:[#allocation5] sm:$0xff]  ;;  %vm580_vm1 = vmmov 0   ;;  %v179_v4 = vlaneseq  ;;  %s380_s15 = sshll.u32 %s618_s13, 7 }
  0x47   : > { %556 = vsyncadd (%p787_p8), [#allocation6], 4294967168  ;;  %v175_v1 = vsel %vm174_vm0, %v172_v0, 0.0  ;;  %385 = vmatprep.subr.mxu0 %v579_v2  ;;  %387 = vmatprep.mubr.msk.f32.mxu0 %vm580_vm1, %v579_v2  ;;  %vm185_vm2 = vcmask 64512   ;;  %s171_s17 = scalar_lea.vmem [#allocation7], %s374_s6  ;;  %s285_s19 = scalar_lea.hbm %s771_s2, %s380_s15 }
  0x48   : > { %176 = vadd.xlane.f32.xlu0 %v175_v1  ;;  %386 = vmatpush3.msra.mxu0 %v173_v3  ;;  %v180_v5 = vand.u32 127, %v179_v4  ;;  %v182_v6 = vshrl.u32 %v179_v4, 7  ;;  %s287_s7 = sshll.u32 %s171_s17, 4  ;;  %s274_s22 = scalar_lea.sflag [#allocation4], %s716_s5  ;;  %s288_s7 = int_to_ptr.vmem [resolvable:$true] %s287_s7 }
  0x49   : > { %s507_s23 = scalar_lea.vmem %s288_s7, 128  ;;  %p788_p11 = scmp.ne.s32.totalorder %s782_s29, 0 }
  0x4a   : > { %v183_v7 = vsub.s32 %v180_v5, %v182_v6  ;;  %v266_v15 = vsub.s32 0, %v182_v6  ;;  %p508_p9 = scmp.ne.s32.totalorder %s288_s7, %s507_s23  ;;  %s581_s24 = smov [#allocation7]  }
  0x4b   : > { %s511_s13 = sshll.u32 %s581_s24, 4  ;;  %s512_s13 = int_to_ptr.vmem [resolvable:$false] %s511_s13 }
  0x4c   : > { %p509_p13 = pnand %p508_p9, %p788_p11  ;;  %s513_s25 = scalar_lea.vmem %s512_s13, 256 }
  0x4d   : > { %p514_p1 = scmp.lt.s32.totalorder %s288_s7, %s512_s13  ;;  %p515_p2 = scmp.lt.s32.totalorder %s513_s25, %s507_s23 }
  0x4e   : > { %p510_p10 = pneg %p509_p13 }
  0x4f   : > { %p516_p0 = por %p515_p2, %p514_p1 }
  0x51   : > { %p517_p3 = pnand %p516_p0, %p510_p10 }
  0xd1   : > { %v177_v8 = vpop.xlane.xlu0 %176 }
  0xd2   : > { %v184_v9 = vrot.slane %v177_v8, %v183_v7 }
  0xd4   : > { %388 = vmatmul.mubr.msk.f32.vlgmr.msra.gmra.mxu0 %vm185_vm2, %v184_v9 }
 0x194   : > { %v254_v10 = vpop.f32.mrf.mxu0 }
 0x195   : > { %v378_v11 = vmul.f32 -1.442695, %v254_v10 }
 0x196   : > { %v389_v12 = vpop.f32.mrf.mxu0 }
 0x197   : > { %449 = vpow2.f32 %v378_v11 }
 0x1a4   : > { %v450_v13 = vpop.eup %449 }
 0x1a5   : > { %v261_v14 = vadd.f32 1.0, %v450_v13 }
 0x1a7   : > { %451 = vrcp.f32 %v261_v14 }
 0x1b4   : > { %v452_v16 = vpop.eup %451 }
 0x1b5   : > { %v267_v17 = vrot.slane %v452_v16, %v266_v15 }
 0x1b7   : > { %269 = vbcast.lane.b32.xlu0 %v267_v17, 256 }
 0x229   : > { %v270_v18 = vpop.permute.xlu0 %269 }
 0x22a   : > { %v271_v19 = vmul.f32 %v270_v18, %v172_v0 }
 0x22c   : > { %272 = vst.msk [vmem:[%s171_s17] sm:$0xff] %vm174_vm0, %v271_v19 }
 0x22d   : > { %520 = shalt.err (!%p517_p3)
}
 0x22e   : > { %s521_s26 = scalar_lea.hbm %s285_s19, 128  ;;  %s525_s3 = scalar_lea.hbm %s771_s2, 256 }
 0x22f   : > { %p522_p12 = scmp.ne.s32.totalorder %s285_s19, %s521_s26  ;;  %p526_p4 = scmp.lt.s32.totalorder %s285_s19, %s771_s2 }
 0x230   : > { %p527_p6 = scmp.lt.s32.totalorder %s525_s3, %s521_s26 }
 0x231   : > { %p523_p5 = pnand %p522_p12, %p788_p11 }
 0x232   : > { %p528_p8 = por %p527_p6, %p526_p4 }
 0x233   : > { %p524_p7 = pneg %p523_p5 }
 0x235   : > { %p529_p9 = pnand %p528_p8, %p524_p7 }
 0x237   : > { %532 = shalt.err (!%p529_p9)
}
 0x238   : > { %396 = dma.vmem_to_hbm [thread:$0]  (%p788_p11), %s288_s7, 128, %s285_s19, %s274_s22  }
 0x239 PF: > { %s299_s6 = sand.u32 1, %s563_s9   ;;  %p789_p13 = scmp.ne.s32.totalorder %s777_s16, 0 }
 0x23a   : > { %p790_p10 = scmp.ge.s32.totalorder %s575_s12, 2  ;;  %s300_s8 = scalar_lea.sflag [#allocation4], %s299_s6 }
 0x23c   : > { %p407_p1 = pnand %p790_p10, %p789_p13 }
 0x23e   : > { %p408_p2 = pneg %p407_p1 }
 0x240   : > { %558 = dma.done.wait (%p408_p2), %s300_s8, 128  }
 0x241   : > { %560 = vsyncadd (%p408_p2), %s300_s8, 4294967168  ;;  %p16_p0 = scmp.ge.s32.totalorder %s645_s20, 4   ;;  %s791_s9 = smov %s567_s10 }
 0x242   : > { %s792_s10 = smov %s571_s11  ;;  %s793_s11 = smov %s672_s28 }
 0x243   : > { %s794_s12 = smov %s645_s20  ;;  %18 = sbr.rel (!%p16_p0) target bundleno = 6 (0x6), region = 77 }
 0x248   :  { %305 = vsyncpa [#allocation3], 1 }
 0x249   :  { %307 = vsyncpa [#allocation3 + $0x1], 1 }
 0x24a   :  { %308 = vsyncpa [#allocation6], 1 }
 0x24b   :  { %309 = vsyncpa [#allocation4], 1 }
 0x24c   :  { %311 = vsyncpa [#allocation4 + $0x1], 1 }

</bundles_post_ra>
